<compile_context>
chip_gen: v7x
topology: tpu7x:2x2x1
jax: 0.10.0
libtpu: 0.0.40
codegen_flags: <defaults>
</compile_context>

<pallas_src>
import functools

import jax
import jax.numpy as jnp
from jax import lax
from jax.experimental import pallas as pl
from jax.experimental.pallas import tpu as pltpu

BN_EPS = 1e-5


def _round_up(x, m):
    return (x + m - 1) // m * m


def _window_linear_relu(x_ref, w_ref, b_ref, t0, tile_t, context_size, dilation):
    """ReLU(sum_c x[t0+c*dil : t0+c*dil+tile_t, :] @ w[c] + b) -> (tile_t, Op) f32."""
    out_dim = w_ref.shape[2]
    acc = jnp.zeros((tile_t, out_dim), jnp.float32)
    for c in range(context_size):  # context_size is small & static -> unrolled
        xs = x_ref[pl.ds(t0 + c * dilation, tile_t), :]        # (tile_t, Dp)
        acc = acc + jnp.dot(xs, w_ref[c], preferred_element_type=jnp.float32)
    return jnp.maximum(acc + b_ref[...], 0.0)


def _tdnn_stats_kernel(x_ref, w_ref, b_ref, sum_ref, sq_ref, s_acc, q_acc, *,
                       context_size, dilation, tile_t, valid_t):
    """Pass 1: per-channel sum / sum-of-squares of ReLU(Linear(unfold(x)))."""
    bb = pl.program_id(0)
    jj = pl.program_id(1)
    t0 = pl.multiple_of(jj * tile_t, 8)

    @pl.when((bb == 0) & (jj == 0))
    def _init():
        s_acc[...] = jnp.zeros_like(s_acc)
        q_acc[...] = jnp.zeros_like(q_acc)

    h = _window_linear_relu(x_ref, w_ref, b_ref, t0, tile_t, context_size, dilation)

    # Rows past the true new_seq_len are time padding; keep them out of the stats.
    row = t0 + lax.broadcasted_iota(jnp.int32, (tile_t, 1), 0)
    h = jnp.where(row < valid_t, h, 0.0)

    s_acc[...] += jnp.sum(h, axis=0, keepdims=True)
    q_acc[...] += jnp.sum(h * h, axis=0, keepdims=True)

    @pl.when((bb == pl.num_programs(0) - 1) & (jj == pl.num_programs(1) - 1))
    def _emit():
        sum_ref[...] = s_acc[...]
        sq_ref[...] = q_acc[...]


def _tdnn_norm_kernel(x_ref, w_ref, b_ref, g_ref, shift_ref, o_ref, *,
                      context_size, dilation, tile_t):
    """Pass 2: recompute ReLU(Linear(unfold(x))) per tile and apply folded BN."""
    jj = pl.program_id(1)
    t0 = pl.multiple_of(jj * tile_t, 8)
    h = _window_linear_relu(x_ref, w_ref, b_ref, t0, tile_t, context_size, dilation)
    o_ref[...] = (h * g_ref[...] + shift_ref[...]).astype(o_ref.dtype)


@functools.partial(jax.jit, static_argnames=("context_size", "dilation", "tile_t"))
def tdnn_forward(x, w, b, gamma, beta, *, context_size, dilation, tile_t=None):
    """x: (B, T, D) f32; w: (ctx*D, O); b/gamma/beta: (O,).  Returns (B, new_T, O)."""
    B, T, D = x.shape
    O = w.shape[1]
    new_T = T - dilation * (context_size - 1)
    if new_T < 1:
        raise ValueError("sequence too short for the requested context/dilation")

    d_p = _round_up(D, 8)      # per-tap contraction dim, sublane aligned
    o_p = _round_up(O, 128)    # lane-dense channel dim -> unmasked full-width stores

    if tile_t is None:
        tile_t = 512           # ~512 rows/tile: good pipelining, small VMEM footprint
    tile_t = max(8, min(_round_up(tile_t, 8), _round_up(new_T, 8)))
    n_t = pl.cdiv(new_T, tile_t)
    new_t_pad = n_t * tile_t
    t_pad = _round_up(new_t_pad + dilation * (context_size - 1), 8)

    # Zero padding: extra time rows / feature cols contribute nothing to matmuls.
    x_p = jnp.pad(x, ((0, 0), (0, t_pad - T), (0, d_p - D)))
    w3 = jnp.pad(w.reshape(context_size, D, O), ((0, 0), (0, d_p - D), (0, o_p - O)))
    b_p = jnp.pad(b.reshape(1, O), ((0, 0), (0, o_p - O)))
    gamma_p = jnp.pad(gamma.reshape(1, O), ((0, 0), (0, o_p - O)))
    beta_p = jnp.pad(beta.reshape(1, O), ((0, 0), (0, o_p - O)))

    grid = (B, n_t)
    # Whole per-batch input stays resident across its time tiles (re-DMA'd only
    # when the batch index changes); the unfold happens in VMEM inside the kernel.
    x_spec = pl.BlockSpec((None, t_pad, d_p), lambda bb, jj: (bb, 0, 0))
    w_spec = pl.BlockSpec((context_size, d_p, o_p), lambda bb, jj: (0, 0, 0))
    vec_spec = pl.BlockSpec((1, o_p), lambda bb, jj: (0, 0))

    vmem_bytes = 4 * (2 * t_pad * d_p + context_size * d_p * o_p
                      + 4 * tile_t * o_p + 16 * o_p) + (2 << 20)
    vmem_limit = int(min(max(2 * vmem_bytes, 32 * 1024 * 1024), 64 * 1024 * 1024))

    mm_flops = 2 * B * new_t_pad * context_size * d_p * o_p

    sums, sqs = pl.pallas_call(
        functools.partial(_tdnn_stats_kernel, context_size=context_size,
                          dilation=dilation, tile_t=tile_t, valid_t=new_T),
        out_shape=(jax.ShapeDtypeStruct((1, o_p), jnp.float32),
                   jax.ShapeDtypeStruct((1, o_p), jnp.float32)),
        grid=grid,
        in_specs=[x_spec, w_spec, vec_spec],
        out_specs=(vec_spec, vec_spec),
        scratch_shapes=[pltpu.VMEM((1, o_p), jnp.float32),
                        pltpu.VMEM((1, o_p), jnp.float32)],
        compiler_params=pltpu.CompilerParams(
            dimension_semantics=("arbitrary", "arbitrary"),
            vmem_limit_bytes=vmem_limit),
        cost_estimate=pl.CostEstimate(
            flops=mm_flops, transcendentals=0,
            bytes_accessed=4 * (B * t_pad * d_p + context_size * d_p * o_p + 2 * o_p)),
    )(x_p, w3, b_p)

    # Finalize BN statistics (global over all B * new_T rows) and fold the affine.
    n_rows = B * new_T
    mean = sums * (1.0 / n_rows)
    var = jnp.maximum(sqs * (1.0 / n_rows) - mean * mean, 0.0)   # biased variance
    g = gamma_p * lax.rsqrt(var + BN_EPS)
    shift = beta_p - mean * g

    out = pl.pallas_call(
        functools.partial(_tdnn_norm_kernel, context_size=context_size,
                          dilation=dilation, tile_t=tile_t),
        out_shape=jax.ShapeDtypeStruct((B, new_t_pad, o_p), jnp.float32),
        grid=grid,
        in_specs=[x_spec, w_spec, vec_spec, vec_spec, vec_spec],
        out_specs=pl.BlockSpec((None, tile_t, o_p), lambda bb, jj: (bb, jj, 0)),
        compiler_params=pltpu.CompilerParams(
            dimension_semantics=("parallel", "parallel"),
            vmem_limit_bytes=vmem_limit),
        cost_estimate=pl.CostEstimate(
            flops=mm_flops + 2 * B * new_t_pad * o_p, transcendentals=0,
            bytes_accessed=4 * (B * t_pad * d_p + context_size * d_p * o_p
                                + 3 * o_p + B * new_t_pad * o_p)),
    )(x_p, w3, b_p, g, shift)

    return out[:, :new_T, :O]


def _reference(x, w, b, gamma, beta, *, context_size, dilation):
    B, T, D = x.shape
    new_T = T - dilation * (context_size - 1)
    frames = [x[:, c * dilation:c * dilation + new_T, :] for c in range(context_size)]
    xu = jnp.concatenate(frames, axis=-1)                        # (B, new_T, ctx*D)
    h = jnp.maximum(
        jnp.einsum("btk,ko->bto", xu, w, precision=lax.Precision.HIGHEST) + b, 0.0)
    mean = jnp.mean(h, axis=(0, 1), keepdims=True)
    var = jnp.mean((h - mean) ** 2, axis=(0, 1), keepdims=True)
    return gamma * (h - mean) / jnp.sqrt(var + BN_EPS) + beta


if __name__ == "__main__":
    configs = [
        # default-ish TDNN layer (small): O padded 64 -> 128 internally
        dict(batch=2, seq_len=16, input_dim=23, output_dim=64, context_size=5,
             dilation=1, tile_t=None),
        # dilation > 1, odd output_dim padding path
        dict(batch=2, seq_len=21, input_dim=23, output_dim=40, context_size=3,
             dilation=2, tile_t=None),
        # force multiple time tiles to exercise tiled stats accumulation + masking
        dict(batch=2, seq_len=16, input_dim=23, output_dim=64, context_size=5,
             dilation=1, tile_t=8),
    ]

    key = jax.random.PRNGKey(0)
    for cfg in configs:
        key, kx, kw, kb, kg, kbeta = jax.random.split(key, 6)
        B, T = cfg["batch"], cfg["seq_len"]
        D, O = cfg["input_dim"], cfg["output_dim"]
        ctx, dil = cfg["context_size"], cfg["dilation"]

        x = jax.random.normal(kx, (B, T, D), jnp.float32)
        fan_in = D * ctx
        bound = 1.0 / (fan_in ** 0.5)
        w = jax.random.uniform(kw, (fan_in, O), jnp.float32, -bound, bound)
        b = jax.random.uniform(kb, (O,), jnp.float32, -bound, bound)
        gamma = jax.random.uniform(kg, (O,), jnp.float32, 0.5, 1.5)
        beta = 0.1 * jax.random.normal(kbeta, (O,), jnp.float32)

        out = tdnn_forward(x, w, b, gamma, beta, context_size=ctx, dilation=dil,
                           tile_t=cfg["tile_t"])
        out = jax.block_until_ready(out)

        new_T = T - dil * (ctx - 1)
        assert out.shape == (B, new_T, O), out.shape
        ref = _reference(x, w, b, gamma, beta, context_size=ctx, dilation=dil)
        assert jnp.allclose(out, ref, atol=5e-3, rtol=5e-3), (
            "mismatch vs. JAX reference: max abs err "
            f"{float(jnp.max(jnp.abs(out - ref)))}")

    print("KERNEL_OK")
</pallas_src>

<mosaic_0001>
module attributes {stable_mosaic.version = 11 : i64} {
  func.func @_tdnn_norm_kernel(%arg0: i32, %arg1: i32, %arg2: memref<1x24x24xf32, #tpu.memory_space<vmem>>, %arg3: memref<5x24x128xf32, #tpu.memory_space<vmem>>, %arg4: memref<1x128xf32, #tpu.memory_space<vmem>>, %arg5: memref<1x128xf32, #tpu.memory_space<vmem>>, %arg6: memref<1x128xf32, #tpu.memory_space<vmem>>, %arg7: memref<1x16x128xf32, #tpu.memory_space<vmem>>) attributes {dimension_semantics = [#tpu.dimension_semantics<parallel>, #tpu.dimension_semantics<parallel>], iteration_bounds = array<i64: 2, 1>, scalar_prefetch = 0 : i64, scratch_operands = 0 : i64, tpu.core_type = #tpu.core_type<tc>, window_params = [{transform_indices = @transform_0, window_bounds = array<i64: 1, 24, 24>}, {pipeline_mode = #tpu.pipeline_mode<synchronous>, transform_indices = @transform_1, window_bounds = array<i64: 5, 24, 128>}, {pipeline_mode = #tpu.pipeline_mode<synchronous>, transform_indices = @transform_2, window_bounds = array<i64: 1, 128>}, {pipeline_mode = #tpu.pipeline_mode<synchronous>, transform_indices = @transform_3, window_bounds = array<i64: 1, 128>}, {pipeline_mode = #tpu.pipeline_mode<synchronous>, transform_indices = @transform_4, window_bounds = array<i64: 1, 128>}, {transform_indices = @transform_5, window_bounds = array<i64: 1, 16, 128>}]} {
    %c16_i32 = arith.constant 16 : i32
    %0 = arith.muli %arg1, %c16_i32 : i32
    %1 = tpu.assume_multiple %0, 8 : i32
    %cst = arith.constant 0.000000e+00 : f32
    %2 = vector.broadcast %cst : f32 to vector<16x128xf32>
    %c0_i32 = arith.constant 0 : i32
    %3 = arith.addi %1, %c0_i32 : i32
    %c0 = arith.constant 0 : index
    %4 = arith.index_cast %3 : i32 to index
    %c0_0 = arith.constant 0 : index
    %5 = vector.load %arg2[%c0, %4, %c0_0] : memref<1x24x24xf32, #tpu.memory_space<vmem>>, vector<1x16x24xf32>
    %6 = vector.shape_cast %5 : vector<1x16x24xf32> to vector<16x24xf32>
    %c0_1 = arith.constant 0 : index
    %c0_2 = arith.constant 0 : index
    %c0_3 = arith.constant 0 : index
    %7 = vector.load %arg3[%c0_1, %c0_2, %c0_3] : memref<5x24x128xf32, #tpu.memory_space<vmem>>, vector<1x24x128xf32>
    %8 = vector.shape_cast %7 : vector<1x24x128xf32> to vector<24x128xf32>
    %cst_4 = arith.constant dense<0.000000e+00> : vector<16x128xf32>
    %9 = tpu.matmul %6, %8, %cst_4 {dimension_numbers = #tpu.dot_dimension_numbers<[1], [0], [0], [1], [0, 0, 1, 1], [], []>} : vector<16x24xf32>, vector<24x128xf32>, vector<16x128xf32> -> vector<16x128xf32>
    %10 = arith.addf %2, %9 : vector<16x128xf32>
    %c1_i32 = arith.constant 1 : i32
    %11 = arith.addi %1, %c1_i32 : i32
    %c0_5 = arith.constant 0 : index
    %12 = arith.index_cast %11 : i32 to index
    %c0_6 = arith.constant 0 : index
    %13 = vector.load %arg2[%c0_5, %12, %c0_6] : memref<1x24x24xf32, #tpu.memory_space<vmem>>, vector<1x16x24xf32>
    %14 = vector.shape_cast %13 : vector<1x16x24xf32> to vector<16x24xf32>
    %c1 = arith.constant 1 : index
    %c0_7 = arith.constant 0 : index
    %c0_8 = arith.constant 0 : index
    %15 = vector.load %arg3[%c1, %c0_7, %c0_8] : memref<5x24x128xf32, #tpu.memory_space<vmem>>, vector<1x24x128xf32>
    %16 = vector.shape_cast %15 : vector<1x24x128xf32> to vector<24x128xf32>
    %cst_9 = arith.constant dense<0.000000e+00> : vector<16x128xf32>
    %17 = tpu.matmul %14, %16, %cst_9 {dimension_numbers = #tpu.dot_dimension_numbers<[1], [0], [0], [1], [0, 0, 1, 1], [], []>} : vector<16x24xf32>, vector<24x128xf32>, vector<16x128xf32> -> vector<16x128xf32>
    %18 = arith.addf %10, %17 : vector<16x128xf32>
    %c2_i32 = arith.constant 2 : i32
    %19 = arith.addi %1, %c2_i32 : i32
    %c0_10 = arith.constant 0 : index
    %20 = arith.index_cast %19 : i32 to index
    %c0_11 = arith.constant 0 : index
    %21 = vector.load %arg2[%c0_10, %20, %c0_11] : memref<1x24x24xf32, #tpu.memory_space<vmem>>, vector<1x16x24xf32>
    %22 = vector.shape_cast %21 : vector<1x16x24xf32> to vector<16x24xf32>
    %c2 = arith.constant 2 : index
    %c0_12 = arith.constant 0 : index
    %c0_13 = arith.constant 0 : index
    %23 = vector.load %arg3[%c2, %c0_12, %c0_13] : memref<5x24x128xf32, #tpu.memory_space<vmem>>, vector<1x24x128xf32>
    %24 = vector.shape_cast %23 : vector<1x24x128xf32> to vector<24x128xf32>
    %cst_14 = arith.constant dense<0.000000e+00> : vector<16x128xf32>
    %25 = tpu.matmul %22, %24, %cst_14 {dimension_numbers = #tpu.dot_dimension_numbers<[1], [0], [0], [1], [0, 0, 1, 1], [], []>} : vector<16x24xf32>, vector<24x128xf32>, vector<16x128xf32> -> vector<16x128xf32>
    %26 = arith.addf %18, %25 : vector<16x128xf32>
    %c3_i32 = arith.constant 3 : i32
    %27 = arith.addi %1, %c3_i32 : i32
    %c0_15 = arith.constant 0 : index
    %28 = arith.index_cast %27 : i32 to index
    %c0_16 = arith.constant 0 : index
    %29 = vector.load %arg2[%c0_15, %28, %c0_16] : memref<1x24x24xf32, #tpu.memory_space<vmem>>, vector<1x16x24xf32>
    %30 = vector.shape_cast %29 : vector<1x16x24xf32> to vector<16x24xf32>
    %c3 = arith.constant 3 : index
    %c0_17 = arith.constant 0 : index
    %c0_18 = arith.constant 0 : index
    %31 = vector.load %arg3[%c3, %c0_17, %c0_18] : memref<5x24x128xf32, #tpu.memory_space<vmem>>, vector<1x24x128xf32>
    %32 = vector.shape_cast %31 : vector<1x24x128xf32> to vector<24x128xf32>
    %cst_19 = arith.constant dense<0.000000e+00> : vector<16x128xf32>
    %33 = tpu.matmul %30, %32, %cst_19 {dimension_numbers = #tpu.dot_dimension_numbers<[1], [0], [0], [1], [0, 0, 1, 1], [], []>} : vector<16x24xf32>, vector<24x128xf32>, vector<16x128xf32> -> vector<16x128xf32>
    %34 = arith.addf %26, %33 : vector<16x128xf32>
    %c4_i32 = arith.constant 4 : i32
    %35 = arith.addi %1, %c4_i32 : i32
    %c0_20 = arith.constant 0 : index
    %36 = arith.index_cast %35 : i32 to index
    %c0_21 = arith.constant 0 : index
    %37 = vector.load %arg2[%c0_20, %36, %c0_21] : memref<1x24x24xf32, #tpu.memory_space<vmem>>, vector<1x16x24xf32>
    %38 = vector.shape_cast %37 : vector<1x16x24xf32> to vector<16x24xf32>
    %c4 = arith.constant 4 : index
    %c0_22 = arith.constant 0 : index
    %c0_23 = arith.constant 0 : index
    %39 = vector.load %arg3[%c4, %c0_22, %c0_23] : memref<5x24x128xf32, #tpu.memory_space<vmem>>, vector<1x24x128xf32>
    %40 = vector.shape_cast %39 : vector<1x24x128xf32> to vector<24x128xf32>
    %cst_24 = arith.constant dense<0.000000e+00> : vector<16x128xf32>
    %41 = tpu.matmul %38, %40, %cst_24 {dimension_numbers = #tpu.dot_dimension_numbers<[1], [0], [0], [1], [0, 0, 1, 1], [], []>} : vector<16x24xf32>, vector<24x128xf32>, vector<16x128xf32> -> vector<16x128xf32>
    %42 = arith.addf %34, %41 : vector<16x128xf32>
    %c0_25 = arith.constant 0 : index
    %c0_26 = arith.constant 0 : index
    %43 = vector.load %arg4[%c0_25, %c0_26] : memref<1x128xf32, #tpu.memory_space<vmem>>, vector<1x128xf32>
    %44 = vector.broadcast %43 : vector<1x128xf32> to vector<16x128xf32>
    %45 = arith.addf %42, %44 : vector<16x128xf32>
    %cst_27 = arith.constant 0.000000e+00 : f32
    %46 = vector.broadcast %cst_27 : f32 to vector<16x128xf32>
    %47 = arith.maximumf %45, %46 : vector<16x128xf32>
    %c0_28 = arith.constant 0 : index
    %c0_29 = arith.constant 0 : index
    %48 = vector.load %arg5[%c0_28, %c0_29] : memref<1x128xf32, #tpu.memory_space<vmem>>, vector<1x128xf32>
    %49 = vector.broadcast %48 : vector<1x128xf32> to vector<16x128xf32>
    %50 = arith.mulf %47, %49 : vector<16x128xf32>
    %c0_30 = arith.constant 0 : index
    %c0_31 = arith.constant 0 : index
    %51 = vector.load %arg6[%c0_30, %c0_31] : memref<1x128xf32, #tpu.memory_space<vmem>>, vector<1x128xf32>
    %52 = vector.broadcast %51 : vector<1x128xf32> to vector<16x128xf32>
    %53 = arith.addf %50, %52 : vector<16x128xf32>
    %c0_32 = arith.constant 0 : index
    %c0_33 = arith.constant 0 : index
    %c0_34 = arith.constant 0 : index
    %54 = vector.load %arg7[%c0_32, %c0_33, %c0_34] : memref<1x16x128xf32, #tpu.memory_space<vmem>>, vector<1x16x128xf32>
    %55 = vector.shape_cast %54 : vector<1x16x128xf32> to vector<16x128xf32>
    %56 = vector.shape_cast %53 : vector<16x128xf32> to vector<1x16x128xf32>
    tpu.vector_store %arg7[%c0_32, %c0_33, %c0_34], %56 {strides = array<i32>} : memref<1x16x128xf32, #tpu.memory_space<vmem>>, vector<1x16x128xf32>,
    return
  }
  func.func @transform_0(%arg0: i32, %arg1: i32) -> (i32, i32, i32) {
    %c0_i32 = arith.constant 0 : i32
    %c0_i32_0 = arith.constant 0 : i32
    %c0_i32_1 = arith.constant 0 : i32
    return %arg0, %c0_i32, %c0_i32_0 : i32, i32, i32
  }
  func.func @transform_1(%arg0: i32, %arg1: i32) -> (i32, i32, i32) {
    %c0_i32 = arith.constant 0 : i32
    %c0_i32_0 = arith.constant 0 : i32
    %c0_i32_1 = arith.constant 0 : i32
    %c0_i32_2 = arith.constant 0 : i32
    return %c0_i32, %c0_i32_0, %c0_i32_1 : i32, i32, i32
  }
  func.func @transform_2(%arg0: i32, %arg1: i32) -> (i32, i32) {
    %c0_i32 = arith.constant 0 : i32
    %c0_i32_0 = arith.constant 0 : i32
    %c0_i32_1 = arith.constant 0 : i32
    return %c0_i32, %c0_i32_0 : i32, i32
  }
  func.func @transform_3(%arg0: i32, %arg1: i32) -> (i32, i32) {
    %c0_i32 = arith.constant 0 : i32
    %c0_i32_0 = arith.constant 0 : i32
    %c0_i32_1 = arith.constant 0 : i32
    return %c0_i32, %c0_i32_0 : i32, i32
  }
  func.func @transform_4(%arg0: i32, %arg1: i32) -> (i32, i32) {
    %c0_i32 = arith.constant 0 : i32
    %c0_i32_0 = arith.constant 0 : i32
    %c0_i32_1 = arith.constant 0 : i32
    return %c0_i32, %c0_i32_0 : i32, i32
  }
  func.func @transform_5(%arg0: i32, %arg1: i32) -> (i32, i32, i32) {
    %c0_i32 = arith.constant 0 : i32
    %c0_i32_0 = arith.constant 0 : i32
    return %arg0, %arg1, %c0_i32 : i32, i32, i32
  }
}

module attributes {stable_mosaic.version = 11 : i64} {
  func.func @_tdnn_stats_kernel(%arg0: i32, %arg1: i32, %arg2: memref<1x24x24xf32, #tpu.memory_space<vmem>>, %arg3: memref<5x24x128xf32, #tpu.memory_space<vmem>>, %arg4: memref<1x128xf32, #tpu.memory_space<vmem>>, %arg5: memref<1x128xf32, #tpu.memory_space<vmem>>, %arg6: memref<1x128xf32, #tpu.memory_space<vmem>>, %arg7: memref<1x128xf32, #tpu.memory_space<vmem>>, %arg8: memref<1x128xf32, #tpu.memory_space<vmem>>) attributes {dimension_semantics = [#tpu.dimension_semantics<arbitrary>, #tpu.dimension_semantics<arbitrary>], iteration_bounds = array<i64: 2, 1>, scalar_prefetch = 0 : i64, scratch_operands = 2 : i64, tpu.core_type = #tpu.core_type<tc>, window_params = [{transform_indices = @transform_0, window_bounds = array<i64: 1, 24, 24>}, {pipeline_mode = #tpu.pipeline_mode<synchronous>, transform_indices = @transform_1, window_bounds = array<i64: 5, 24, 128>}, {pipeline_mode = #tpu.pipeline_mode<synchronous>, transform_indices = @transform_2, window_bounds = array<i64: 1, 128>}, {pipeline_mode = #tpu.pipeline_mode<synchronous>, transform_indices = @transform_3, window_bounds = array<i64: 1, 128>}, {pipeline_mode = #tpu.pipeline_mode<synchronous>, transform_indices = @transform_4, window_bounds = array<i64: 1, 128>}]} {
    %c16_i32 = arith.constant 16 : i32
    %0 = arith.muli %arg1, %c16_i32 : i32
    %1 = tpu.assume_multiple %0, 8 : i32
    %c0_i32 = arith.constant 0 : i32
    %2 = arith.cmpi eq, %arg0, %c0_i32 : i32
    %c0_i32_0 = arith.constant 0 : i32
    %3 = arith.cmpi eq, %arg1, %c0_i32_0 : i32
    %4 = arith.andi %2, %3 : i1
    %5 = arith.extui %4 : i1 to i32
    %c0_i32_1 = arith.constant 0 : i32
    %6 = arith.cmpi ne, %5, %c0_i32_1 : i32
    scf.if %6 {
      %cst_45 = arith.constant 0.000000e+00 : f32
      %78 = vector.broadcast %cst_45 : f32 to vector<1x128xf32>
      %c0_46 = arith.constant 0 : index
      %c0_47 = arith.constant 0 : index
      %79 = vector.load %arg7[%c0_46, %c0_47] : memref<1x128xf32, #tpu.memory_space<vmem>>, vector<1x128xf32>
      tpu.vector_store %arg7[%c0_46, %c0_47], %78 {strides = array<i32>} : memref<1x128xf32, #tpu.memory_space<vmem>>, vector<1x128xf32>,
      %cst_48 = arith.constant 0.000000e+00 : f32
      %80 = vector.broadcast %cst_48 : f32 to vector<1x128xf32>
      %c0_49 = arith.constant 0 : index
      %c0_50 = arith.constant 0 : index
      %81 = vector.load %arg8[%c0_49, %c0_50] : memref<1x128xf32, #tpu.memory_space<vmem>>, vector<1x128xf32>
      tpu.vector_store %arg8[%c0_49, %c0_50], %80 {strides = array<i32>} : memref<1x128xf32, #tpu.memory_space<vmem>>, vector<1x128xf32>,
    } else {
    }
    %cst = arith.constant 0.000000e+00 : f32
    %7 = vector.broadcast %cst : f32 to vector<16x128xf32>
    %c0_i32_2 = arith.constant 0 : i32
    %8 = arith.addi %1, %c0_i32_2 : i32
    %c0 = arith.constant 0 : index
    %9 = arith.index_cast %8 : i32 to index
    %c0_3 = arith.constant 0 : index
    %10 = vector.load %arg2[%c0, %9, %c0_3] : memref<1x24x24xf32, #tpu.memory_space<vmem>>, vector<1x16x24xf32>
    %11 = vector.shape_cast %10 : vector<1x16x24xf32> to vector<16x24xf32>
    %c0_4 = arith.constant 0 : index
    %c0_5 = arith.constant 0 : index
    %c0_6 = arith.constant 0 : index
    %12 = vector.load %arg3[%c0_4, %c0_5, %c0_6] : memref<5x24x128xf32, #tpu.memory_space<vmem>>, vector<1x24x128xf32>
    %13 = vector.shape_cast %12 : vector<1x24x128xf32> to vector<24x128xf32>
    %cst_7 = arith.constant dense<0.000000e+00> : vector<16x128xf32>
    %14 = tpu.matmul %11, %13, %cst_7 {dimension_numbers = #tpu.dot_dimension_numbers<[1], [0], [0], [1], [0, 0, 1, 1], [], []>} : vector<16x24xf32>, vector<24x128xf32>, vector<16x128xf32> -> vector<16x128xf32>
    %15 = arith.addf %7, %14 : vector<16x128xf32>
    %c1_i32 = arith.constant 1 : i32
    %16 = arith.addi %1, %c1_i32 : i32
    %c0_8 = arith.constant 0 : index
    %17 = arith.index_cast %16 : i32 to index
    %c0_9 = arith.constant 0 : index
    %18 = vector.load %arg2[%c0_8, %17, %c0_9] : memref<1x24x24xf32, #tpu.memory_space<vmem>>, vector<1x16x24xf32>
    %19 = vector.shape_cast %18 : vector<1x16x24xf32> to vector<16x24xf32>
    %c1 = arith.constant 1 : index
    %c0_10 = arith.constant 0 : index
    %c0_11 = arith.constant 0 : index
    %20 = vector.load %arg3[%c1, %c0_10, %c0_11] : memref<5x24x128xf32, #tpu.memory_space<vmem>>, vector<1x24x128xf32>
    %21 = vector.shape_cast %20 : vector<1x24x128xf32> to vector<24x128xf32>
    %cst_12 = arith.constant dense<0.000000e+00> : vector<16x128xf32>
    %22 = tpu.matmul %19, %21, %cst_12 {dimension_numbers = #tpu.dot_dimension_numbers<[1], [0], [0], [1], [0, 0, 1, 1], [], []>} : vector<16x24xf32>, vector<24x128xf32>, vector<16x128xf32> -> vector<16x128xf32>
    %23 = arith.addf %15, %22 : vector<16x128xf32>
    %c2_i32 = arith.constant 2 : i32
    %24 = arith.addi %1, %c2_i32 : i32
    %c0_13 = arith.constant 0 : index
    %25 = arith.index_cast %24 : i32 to index
    %c0_14 = arith.constant 0 : index
    %26 = vector.load %arg2[%c0_13, %25, %c0_14] : memref<1x24x24xf32, #tpu.memory_space<vmem>>, vector<1x16x24xf32>
    %27 = vector.shape_cast %26 : vector<1x16x24xf32> to vector<16x24xf32>
    %c2 = arith.constant 2 : index
    %c0_15 = arith.constant 0 : index
    %c0_16 = arith.constant 0 : index
    %28 = vector.load %arg3[%c2, %c0_15, %c0_16] : memref<5x24x128xf32, #tpu.memory_space<vmem>>, vector<1x24x128xf32>
    %29 = vector.shape_cast %28 : vector<1x24x128xf32> to vector<24x128xf32>
    %cst_17 = arith.constant dense<0.000000e+00> : vector<16x128xf32>
    %30 = tpu.matmul %27, %29, %cst_17 {dimension_numbers = #tpu.dot_dimension_numbers<[1], [0], [0], [1], [0, 0, 1, 1], [], []>} : vector<16x24xf32>, vector<24x128xf32>, vector<16x128xf32> -> vector<16x128xf32>
    %31 = arith.addf %23, %30 : vector<16x128xf32>
    %c3_i32 = arith.constant 3 : i32
    %32 = arith.addi %1, %c3_i32 : i32
    %c0_18 = arith.constant 0 : index
    %33 = arith.index_cast %32 : i32 to index
    %c0_19 = arith.constant 0 : index
    %34 = vector.load %arg2[%c0_18, %33, %c0_19] : memref<1x24x24xf32, #tpu.memory_space<vmem>>, vector<1x16x24xf32>
    %35 = vector.shape_cast %34 : vector<1x16x24xf32> to vector<16x24xf32>
    %c3 = arith.constant 3 : index
    %c0_20 = arith.constant 0 : index
    %c0_21 = arith.constant 0 : index
    %36 = vector.load %arg3[%c3, %c0_20, %c0_21] : memref<5x24x128xf32, #tpu.memory_space<vmem>>, vector<1x24x128xf32>
    %37 = vector.shape_cast %36 : vector<1x24x128xf32> to vector<24x128xf32>
    %cst_22 = arith.constant dense<0.000000e+00> : vector<16x128xf32>
    %38 = tpu.matmul %35, %37, %cst_22 {dimension_numbers = #tpu.dot_dimension_numbers<[1], [0], [0], [1], [0, 0, 1, 1], [], []>} : vector<16x24xf32>, vector<24x128xf32>, vector<16x128xf32> -> vector<16x128xf32>
    %39 = arith.addf %31, %38 : vector<16x128xf32>
    %c4_i32 = arith.constant 4 : i32
    %40 = arith.addi %1, %c4_i32 : i32
    %c0_23 = arith.constant 0 : index
    %41 = arith.index_cast %40 : i32 to index
    %c0_24 = arith.constant 0 : index
    %42 = vector.load %arg2[%c0_23, %41, %c0_24] : memref<1x24x24xf32, #tpu.memory_space<vmem>>, vector<1x16x24xf32>
    %43 = vector.shape_cast %42 : vector<1x16x24xf32> to vector<16x24xf32>
    %c4 = arith.constant 4 : index
    %c0_25 = arith.constant 0 : index
    %c0_26 = arith.constant 0 : index
    %44 = vector.load %arg3[%c4, %c0_25, %c0_26] : memref<5x24x128xf32, #tpu.memory_space<vmem>>, vector<1x24x128xf32>
    %45 = vector.shape_cast %44 : vector<1x24x128xf32> to vector<24x128xf32>
    %cst_27 = arith.constant dense<0.000000e+00> : vector<16x128xf32>
    %46 = tpu.matmul %43, %45, %cst_27 {dimension_numbers = #tpu.dot_dimension_numbers<[1], [0], [0], [1], [0, 0, 1, 1], [], []>} : vector<16x24xf32>, vector<24x128xf32>, vector<16x128xf32> -> vector<16x128xf32>
    %47 = arith.addf %39, %46 : vector<16x128xf32>
    %c0_28 = arith.constant 0 : index
    %c0_29 = arith.constant 0 : index
    %48 = vector.load %arg4[%c0_28, %c0_29] : memref<1x128xf32, #tpu.memory_space<vmem>>, vector<1x128xf32>
    %49 = vector.broadcast %48 : vector<1x128xf32> to vector<16x128xf32>
    %50 = arith.addf %47, %49 : vector<16x128xf32>
    %cst_30 = arith.constant 0.000000e+00 : f32
    %51 = vector.broadcast %cst_30 : f32 to vector<16x128xf32>
    %52 = arith.maximumf %50, %51 : vector<16x128xf32>
    %53 = tpu.iota {dimensions = array<i32: 0>} : vector<16x1xi32>
    %54 = vector.broadcast %1 : i32 to vector<16x1xi32>
    %55 = arith.addi %54, %53 : vector<16x1xi32>
    %c12_i32 = arith.constant 12 : i32
    %56 = vector.broadcast %c12_i32 : i32 to vector<16x1xi32>
    %57 = arith.cmpi slt, %55, %56 : vector<16x1xi32>
    %cst_31 = arith.constant 0.000000e+00 : f32
    %58 = vector.shape_cast %57 : vector<16x1xi1> to vector<16x1xi1>
    %59 = vector.broadcast %58 : vector<16x1xi1> to vector<16x128xi1>
    %60 = vector.broadcast %cst_31 : f32 to vector<16x128xf32>
    %61 = arith.select %59, %52, %60 : vector<16x128xi1>, vector<16x128xf32>
    %c0_32 = arith.constant 0 : index
    %c0_33 = arith.constant 0 : index
    %62 = vector.load %arg7[%c0_32, %c0_33] : memref<1x128xf32, #tpu.memory_space<vmem>>, vector<1x128xf32>
    %cst_34 = arith.constant dense<0.000000e+00> : vector<128xf32>
    %63 = vector.multi_reduction <add>, %61, %cst_34 [0] : vector<16x128xf32> to vector<128xf32>
    %64 = vector.shape_cast %63 : vector<128xf32> to vector<1x128xf32>
    %65 = arith.addf %62, %64 : vector<1x128xf32>
    %c0_35 = arith.constant 0 : index
    %c0_36 = arith.constant 0 : index
    %66 = vector.load %arg7[%c0_35, %c0_36] : memref<1x128xf32, #tpu.memory_space<vmem>>, vector<1x128xf32>
    tpu.vector_store %arg7[%c0_35, %c0_36], %65 {strides = array<i32>} : memref<1x128xf32, #tpu.memory_space<vmem>>, vector<1x128xf32>,
    %c0_37 = arith.constant 0 : index
    %c0_38 = arith.constant 0 : index
    %67 = vector.load %arg8[%c0_37, %c0_38] : memref<1x128xf32, #tpu.memory_space<vmem>>, vector<1x128xf32>
    %68 = arith.mulf %61, %61 : vector<16x128xf32>
    %cst_39 = arith.constant dense<0.000000e+00> : vector<128xf32>
    %69 = vector.multi_reduction <add>, %68, %cst_39 [0] : vector<16x128xf32> to vector<128xf32>
    %70 = vector.shape_cast %69 : vector<128xf32> to vector<1x128xf32>
    %71 = arith.addf %67, %70 : vector<1x128xf32>
    %c0_40 = arith.constant 0 : index
    %c0_41 = arith.constant 0 : index
    %72 = vector.load %arg8[%c0_40, %c0_41] : memref<1x128xf32, #tpu.memory_space<vmem>>, vector<1x128xf32>
    tpu.vector_store %arg8[%c0_40, %c0_41], %71 {strides = array<i32>} : memref<1x128xf32, #tpu.memory_space<vmem>>, vector<1x128xf32>,
    %c1_i32_42 = arith.constant 1 : i32
    %73 = arith.cmpi eq, %arg0, %c1_i32_42 : i32
    %c0_i32_43 = arith.constant 0 : i32
    %74 = arith.cmpi eq, %arg1, %c0_i32_43 : i32
    %75 = arith.andi %73, %74 : i1
    %76 = arith.extui %75 : i1 to i32
    %c0_i32_44 = arith.constant 0 : i32
    %77 = arith.cmpi ne, %76, %c0_i32_44 : i32
    scf.if %77 {
      %c0_45 = arith.constant 0 : index
      %c0_46 = arith.constant 0 : index
      %78 = vector.load %arg7[%c0_45, %c0_46] : memref<1x128xf32, #tpu.memory_space<vmem>>, vector<1x128xf32>
      %c0_47 = arith.constant 0 : index
      %c0_48 = arith.constant 0 : index
      %79 = vector.load %arg5[%c0_47, %c0_48] : memref<1x128xf32, #tpu.memory_space<vmem>>, vector<1x128xf32>
      tpu.vector_store %arg5[%c0_47, %c0_48], %78 {strides = array<i32>} : memref<1x128xf32, #tpu.memory_space<vmem>>, vector<1x128xf32>,
      %c0_49 = arith.constant 0 : index
      %c0_50 = arith.constant 0 : index
      %80 = vector.load %arg8[%c0_49, %c0_50] : memref<1x128xf32, #tpu.memory_space<vmem>>, vector<1x128xf32>
      %c0_51 = arith.constant 0 : index
      %c0_52 = arith.constant 0 : index
      %81 = vector.load %arg6[%c0_51, %c0_52] : memref<1x128xf32, #tpu.memory_space<vmem>>, vector<1x128xf32>
      tpu.vector_store %arg6[%c0_51, %c0_52], %80 {strides = array<i32>} : memref<1x128xf32, #tpu.memory_space<vmem>>, vector<1x128xf32>,
    } else {
    }
    return
  }
  func.func @transform_0(%arg0: i32, %arg1: i32) -> (i32, i32, i32) {
    %c0_i32 = arith.constant 0 : i32
    %c0_i32_0 = arith.constant 0 : i32
    %c0_i32_1 = arith.constant 0 : i32
    return %arg0, %c0_i32, %c0_i32_0 : i32, i32, i32
  }
  func.func @transform_1(%arg0: i32, %arg1: i32) -> (i32, i32, i32) {
    %c0_i32 = arith.constant 0 : i32
    %c0_i32_0 = arith.constant 0 : i32
    %c0_i32_1 = arith.constant 0 : i32
    %c0_i32_2 = arith.constant 0 : i32
    return %c0_i32, %c0_i32_0, %c0_i32_1 : i32, i32, i32
  }
  func.func @transform_2(%arg0: i32, %arg1: i32) -> (i32, i32) {
    %c0_i32 = arith.constant 0 : i32
    %c0_i32_0 = arith.constant 0 : i32
    %c0_i32_1 = arith.constant 0 : i32
    return %c0_i32, %c0_i32_0 : i32, i32
  }
  func.func @transform_3(%arg0: i32, %arg1: i32) -> (i32, i32) {
    %c0_i32 = arith.constant 0 : i32
    %c0_i32_0 = arith.constant 0 : i32
    %c0_i32_1 = arith.constant 0 : i32
    return %c0_i32, %c0_i32_0 : i32, i32
  }
  func.func @transform_4(%arg0: i32, %arg1: i32) -> (i32, i32) {
    %c0_i32 = arith.constant 0 : i32
    %c0_i32_0 = arith.constant 0 : i32
    %c0_i32_1 = arith.constant 0 : i32
    return %c0_i32, %c0_i32_0 : i32, i32
  }
}

</mosaic_0001>

<bundles_post_ra>
// kernel: tdnn_forward.3
= control target key start
LH: loop header
LB: loop body
LE: loop exit
PB: predicated region body
PF: predicated region fallthrough
CT: control target
= control target key end

     0   :  { %s1046_s18 = smov 0   ;;  %s1048_s19 = smov 0   ;;  %s1159_s0 = inlined_call_operand.vmem [shape: f32[2,24,24], index: 0, kind: input, shape index: {}]   ;;  %s1160_s1 = inlined_call_operand.vmem [shape: f32[5,24,128], index: 1, kind: input, shape index: {}]   ;;  %s1161_s2 = inlined_call_operand.vmem [shape: f32[1,128], index: 2, kind: input, shape index: {}]   ;;  %s1162_s3 = inlined_call_operand.vmem [shape: f32[1,128], index: 3, kind: input, shape index: {}]   ;;  %s1163_s4 = inlined_call_operand.vmem [shape: f32[1,128], index: 4, kind: input, shape index: {}]   ;;  %s1164_s5 = inlined_call_operand.vmem [shape: f32[2,16,128], index: 5, kind: output, shape index: {}]  }
   0x1   :  { %s1050_s20 = smov 0  }
   0x2 LB: > { %s27_s21 = sadd.s32 1, %s1010_s19  ;;  %p829_p0 = scmp.ge.s32.totalorder %s1014_s20, 1  ;;  %s1014_s20 = sphi %s1050_s20, %s15_s20   ;;  %s1010_s19 = sphi %s1048_s19, %s1166_s19   ;;  %s1006_s18 = sphi %s1046_s18, %s1165_s18  }
   0x3   : > { %p29_p1 = scmp.ge.s32.totalorder %s27_s21, 2  ;;  %p201_p2 = scmp.lt.s32.totalorder %s1014_s20, 3 }
   0x5   : > { %s1168_s21 = smov (%p29_p1, %s27_s21), 0  ;;  %p202_p3 = pnand %p829_p0, %p201_p2 }
   0x6   : > { %v835_v0 = vld [vmem:[%s1160_s1 + $0x18] sm:$0xff] (!%p202_p3)  ;;  %v836_v1 = vld [vmem:[%s1160_s1 + $0x20] sm:$0xff] (!%p202_p3)  ;;  %v844_v2 = vld [vmem:[%s1160_s1 + $0x30] sm:$0xff] (!%p202_p3)  ;;  %p233_p4 = scmp.lt.s32.totalorder (!%p202_p3), %s1006_s18, 1  ;;  %vm263_vm0 = vcmask (!%p202_p3), 195584  }
   0x7   : > { %205 = sbr.rel (%p202_p3) target bundleno = 261 (0x105), region = 40  ;;  %v939_v3 = vpack.c.bf16 (!%p202_p3), %v836_v1, %v835_v0  ;;  %v845_v4 = vld [vmem:[%s1160_s1 + $0x38] sm:$0xff] (!%p202_p3)  ;;  %v837_v6 = vld [vmem:[%s1160_s1 + $0x28] sm:$0xff] (!%p202_p3)  ;;  %v846_v7 = vld [vmem:[%s1160_s1 + $0x40] sm:$0xff] (!%p202_p3) }
   0x8   : > { %v947_v5 = vpack.c.bf16 (!%p202_p3), %v845_v4, %v844_v2  ;;  %v851_v8 = vld [vmem:[%s1160_s1 + $0x48] sm:$0xff] (!%p202_p3)  ;;  %v852_v9 = vld [vmem:[%s1160_s1 + $0x50] sm:$0xff] (!%p202_p3)  ;;  %v252_v10 = vld [vmem:[%s1160_s1] sm:$0xff] (!%p202_p3) }
   0x9   : > { %940 = vmatprep.subr.bf16.mxu1 (!%p202_p3), %v939_v3  ;;  %v253_v11 = vld [vmem:[%s1160_s1 + $0x8] sm:$0xff] (!%p202_p3)  ;;  %v951_v15 = vpack.c.bf16 (!%p202_p3), %v852_v9, %v851_v8  ;;  %v853_v18 = vld [vmem:[%s1160_s1 + $0x58] sm:$0xff] (!%p202_p3)  ;;  %v254_v19 = vld [vmem:[%s1160_s1 + $0x10] sm:$0xff] (!%p202_p3) }
   0xa   : > { %948 = vmatprep.subr.bf16.mxu0 (!%p202_p3), %v947_v5  ;;  %942 = vmatpush3.bf16.msra.mxu1 (!%p202_p3), %v939_v3  ;;  %v943_v16 = vpack.c.bf16 (!%p202_p3), %v253_v11, %v252_v10  ;;  %v858_v20 = vld [vmem:[%s1160_s1 + $0x60] sm:$0xff] (!%p202_p3)  ;;  %v859_v21 = vld [vmem:[%s1160_s1 + $0x68] sm:$0xff] (!%p202_p3)  ;;  %v860_v28 = vld [vmem:[%s1160_s1 + $0x70] sm:$0xff] (!%p202_p3) }
   0xb   : > { %950 = vmatpush3.bf16.msra.mxu0 (!%p202_p3), %v947_v5  ;;  %898 = vmatprep.subr.mxu1 (!%p202_p3), %v837_v6  ;;  %v955_v24 = vpack.c.bf16 (!%p202_p3), %v859_v21, %v858_v20  ;;  %v863_v33 = vld [vmem:[%s1161_s2] ss:$0 sm:$0xff] (!%p202_p3) }
   0xc   : > { %916 = vmatprep.subr.mxu0 (!%p202_p3), %v846_v7  ;;  %v864_v38 = vld [vmem:[%s1162_s3] ss:$0 sm:$0xff] (!%p202_p3) }
   0xd   : > { %v865_v41 = vld [vmem:[%s1163_s4] ss:$0 sm:$0xff] (!%p202_p3) }
   0xe   : > { %s1170_s18 = smov (!%p233_p4, %s1006_s18), 1  ;;  %899 = vmatpush3.msra.mxu1 %v837_v6 }
   0xf   : > { %s967_s11 = smul.u32 24, %s1170_s18  ;;  %917 = vmatpush3.msra.mxu0 %v846_v7  ;;  %944 = vmatprep.subr.bf16.mxu1 %v943_v16  ;;  %s868_s14 = sshll.u32 %s1170_s18, 4 }
  0x10   : > { %952 = vmatprep.subr.bf16.mxu0 %v951_v15  ;;  %s246_s23 = scalar_lea.vmem %s1164_s5, %s868_s14 }
  0x11   : > { %s1100_s24 = scalar_lea.vmem %s1159_s0, %s967_s11 }
  0x12   : > { %v833_v12 = vld [vmem:[%s1100_s24 + $0x1] sm:$0xff]  ;;  %v834_v14 = vld [vmem:[%s1100_s24 + $0x9] sm:$0xff] }
  0x13   : > { %v842_v13 = vld [vmem:[%s1100_s24 + $0x2] sm:$0xff]  ;;  %900 = vmatprep.mubr.msk.f32.mxu1 %vm263_vm0, %v833_v12  ;;  %v843_v17 = vld [vmem:[%s1100_s24 + $0xa] sm:$0xff] }
  0x14   : > { %918 = vmatprep.mubr.msk.f32.mxu0 %vm263_vm0, %v842_v13  ;;  %901 = vmatmul.mubr.msk.f32.vlgmr.msra.gmra.mrb[0].mxu1 %vm263_vm0, %v834_v14  ;;  %v250_v22 = vld [vmem:[%s1100_s24] sm:$0xff]  ;;  %v251_v25 = vld [vmem:[%s1100_s24 + $0x8] sm:$0xff] }
  0x15   : > { %919 = vmatmul.mubr.msk.f32.vlgmr.msra.gmra.mrb[0].mxu0 %vm263_vm0, %v843_v17  ;;  %v849_v23 = vld [vmem:[%s1100_s24 + $0x3] sm:$0xff]  ;;  %946 = vmatpush3.bf16.msra.mxu1 %v943_v16  ;;  %v850_v26 = vld [vmem:[%s1100_s24 + $0xb] sm:$0xff] }
  0x16   : > { %954 = vmatpush3.bf16.msra.mxu0 %v951_v15  ;;  %907 = vmatprep.subr.mxu1 %v254_v19  ;;  %v856_v27 = vld [vmem:[%s1100_s24 + $0x4] sm:$0xff]  ;;  %v857_v29 = vld [vmem:[%s1100_s24 + $0xc] sm:$0xff] }
  0x17   : > { %925 = vmatprep.subr.mxu0 %v853_v18  ;;  %909 = vmatprep.mubr.msk.f32.mxu1 %vm263_vm0, %v250_v22 }
  0x18   : > { %927 = vmatprep.mubr.msk.f32.mxu0 %vm263_vm0, %v849_v23 }
  0x19   : > { %908 = vmatpush3.msra.mxu1 %v254_v19 }
  0x1a   : > { %926 = vmatpush3.msra.mxu0 %v853_v18 }
  0x1b   : > { %956 = vmatprep.subr.bf16.mxu0 %v955_v24 }
  0x1c   : > { %910 = vmatmul.mubr.msk.f32.vlgmr.msra.gmra.mrb[0].mxu1 %vm263_vm0, %v251_v25 }
  0x1d   : > { %928 = vmatmul.mubr.msk.f32.vlgmr.msra.gmra.mrb[0].mxu0 %vm263_vm0, %v850_v26 }
  0x1e   : > { %958 = vmatpush3.bf16.msra.mxu0 %v955_v24  ;;  %936 = vmatprep.mubr.msk.f32.mxu0 %vm263_vm0, %v856_v27 }
  0x1f   : > { %934 = vmatprep.subr.mxu0 %v860_v28 }
  0x22   : > { %935 = vmatpush3.msra.mxu0 %v860_v28 }
  0x25   : > { %937 = vmatmul.mubr.msk.f32.vlgmr.msra.gmra.mrb[0].mxu0 %vm263_vm0, %v857_v29 }
  0xef   : > { %v911_v30 = vpop.f32.mrb[0].mxu1 }
  0xf0   : > { %v417_v31 = vpop.f32.mrb[1].mxu1 }
  0xf8   : > { %v938_v32 = vpop.f32.mrb[0].mxu0 }
  0xf9   : > { %v959_v34 = vadd.f32 %v938_v32, %v911_v30  ;;  %v688_v35 = vpop.f32.mrb[1].mxu0 }
  0xfa   : > { %v960_v36 = vadd.f32 %v688_v35, %v417_v31 }
  0xfb   : > { %v707_v37 = vadd.f32 %v959_v34, %v863_v33 }
  0xfc   : > { %v706_v39 = vadd.f32 %v960_v36, %v863_v33 }
  0xfd   : > { %v709_v40 = vmax.f32 %v707_v37, 0.0 }
  0xfe   : > { %v708_v42 = vmax.f32 %v706_v39, 0.0 }
  0xff   : > { %v718_v43 = vmul.f32 %v864_v38, %v709_v40 }
 0x100   : > { %v717_v44 = vmul.f32 %v864_v38, %v708_v42 }
 0x101   : > { %v727_v45 = vadd.f32 %v865_v41, %v718_v43 }
 0x102   : > { %v726_v46 = vadd.f32 %v865_v41, %v717_v44 }
 0x103   : > { %729 = vst [vmem:[%s246_s23 + $0x8] sm:$0xff] %v727_v45 }
 0x104   : > { %728 = vst [vmem:[%s246_s23] sm:$0xff] %v726_v46 }
 0x105 PF: > { %s15_s20 = sadd.s32 1, %s1014_s20   ;;  %s1165_s18 = smov %s1010_s19 }
 0x106   : > { %p12_p5 = scmp.ge.s32.totalorder %s15_s20, 4   ;;  %s1166_s19 = smov %s1168_s21 }
 0x108   :  { %14 = sbr.rel (!%p12_p5) target bundleno = 2 (0x2), region = 79 }

// kernel: tdnn_forward.2
= control target key start
LH: loop header
LB: loop body
LE: loop exit
PB: predicated region body
PF: predicated region fallthrough
CT: control target
= control target key end

     0   :  { %s980_s15 = smov 0   ;;  %s982_s16 = smov 0   ;;  %s1094_s0 = inlined_call_operand.vmem [shape: f32[2,24,24], index: 0, kind: input, shape index: {}]   ;;  %s1095_s1 = inlined_call_operand.vmem [shape: f32[5,24,128], index: 1, kind: input, shape index: {}]   ;;  %s1096_s2 = inlined_call_operand.vmem [shape: f32[1,128], index: 2, kind: input, shape index: {}]   ;;  %s1097_s3 = inlined_call_operand.vmem [shape: f32[1,128], index: 3, kind: output, shape index: {0}]   ;;  %s1098_s4 = inlined_call_operand.vmem [shape: f32[1,128], index: 4, kind: output, shape index: {1}]  }
   0x1   :  { %s984_s17 = smov 0  }
   0x2 LB: > { %s27_s18 = sadd.s32 1, %s948_s16  ;;  %p767_p0 = scmp.ge.s32.totalorder %s952_s17, 1  ;;  %s952_s17 = sphi %s984_s17, %s15_s17   ;;  %s948_s16 = sphi %s982_s16, %s1100_s16   ;;  %s944_s15 = sphi %s980_s15, %s1099_s15  }
   0x3   : > { %p29_p1 = scmp.ge.s32.totalorder %s27_s18, 2  ;;  %p167_p2 = scmp.lt.s32.totalorder %s952_s17, 3 }
   0x5   : > { %s1102_s18 = smov (%p29_p1, %s27_s18), 0  ;;  %p168_p3 = pnand %p767_p0, %p167_p2 }
   0x6   : > { %p188_p4 = scmp.lt.s32.totalorder (!%p168_p3), %s944_s15, 1  ;;  %p194_p5 = scmp.eq.s32.totalorder (!%p168_p3), %s944_s15, 0 }
   0x7   : > { %171 = sbr.rel (%p168_p3) target bundleno = 294 (0x126), region = 32 }
   0xe   : > { %s189_s19 = scalar_select %p188_p4, %s944_s15, 1 }
   0xf   : > { %199 = sbr.rel (!%p194_p5) target bundleno = 22 (0x16), region = 36  ;;  %v954_v0 = vmov (%p194_p5), 0.0  }
  0x10   : > { %s904_s20 = smul.u32 24, %s189_s19  ;;  %200 = vst [vmem:[#allocation2] sm:$0x1] (%p194_p5), %v954_v0  ;;  %201 = vst [vmem:[#allocation3] sm:$0x1] (%p194_p5), %v954_v0 }
  0x12   : > { %s1006_s23 = scalar_lea.vmem %s1094_s0, %s904_s20 }
  0x16 PF: > { %v772_v1 = vld [vmem:[%s1095_s1 + $0x18] sm:$0xff]  ;;  %v773_v2 = vld [vmem:[%s1095_s1 + $0x20] sm:$0xff]  ;;  %v781_v3 = vld [vmem:[%s1095_s1 + $0x30] sm:$0xff]  ;;  %vm216_vm0 = vcmask 195584   ;;  %p699_p6 = scmp.eq.s32.totalorder %s944_s15, 1  ;;  %v663_v33 = vlaneseq }
  0x17   : > { %v876_v4 = vpack.c.bf16 %v773_v2, %v772_v1  ;;  %v782_v5 = vld [vmem:[%s1095_s1 + $0x38] sm:$0xff]  ;;  %v774_v7 = vld [vmem:[%s1095_s1 + $0x28] sm:$0xff]  ;;  %v783_v8 = vld [vmem:[%s1095_s1 + $0x40] sm:$0xff] }
  0x18   : > { %v884_v6 = vpack.c.bf16 %v782_v5, %v781_v3  ;;  %v770_v9 = vld [vmem:[%s1006_s23 + $0x1] sm:$0xff]  ;;  %v789_v12 = vld [vmem:[%s1095_s1 + $0x50] sm:$0xff]  ;;  %v790_v19 = vld [vmem:[%s1095_s1 + $0x58] sm:$0xff]  ;;  %v664_v34 = vshrl.u32 %v663_v33, 7 }
  0x19   : > { %877 = vmatprep.subr.bf16.mxu1 %v876_v4  ;;  %837 = vmatprep.mubr.msk.f32.mxu1 %vm216_vm0, %v770_v9  ;;  %v779_v10 = vld [vmem:[%s1006_s23 + $0x2] sm:$0xff]  ;;  %v780_v17 = vld [vmem:[%s1006_s23 + $0xa] sm:$0xff]  ;;  %v800_v36 = vld [vmem:[%s1096_s2] ss:$0 sm:$0xff] }
  0x1a   : > { %v788_v11 = vld [vmem:[%s1095_s1 + $0x48] sm:$0xff]  ;;  %885 = vmatprep.subr.bf16.mxu0 %v884_v6  ;;  %879 = vmatpush3.bf16.msra.mxu1 %v876_v4  ;;  %v205_v13 = vld [vmem:[%s1095_s1] sm:$0xff]  ;;  %v207_v22 = vld [vmem:[%s1095_s1 + $0x10] sm:$0xff]  ;;  %v665_v37 = vadd.s32 8, %v664_v34 }
  0x1b   : > { %v206_v14 = vld [vmem:[%s1095_s1 + $0x8] sm:$0xff]  ;;  %887 = vmatpush3.bf16.msra.mxu0 %v884_v6  ;;  %835 = vmatprep.subr.mxu1 %v774_v7  ;;  %v888_v16 = vpack.c.bf16 %v789_v12, %v788_v11  ;;  %v795_v20 = vld [vmem:[%s1095_s1 + $0x60] sm:$0xff]  ;;  %v797_v29 = vld [vmem:[%s1095_s1 + $0x70] sm:$0xff] }
  0x1c   : > { %853 = vmatprep.subr.mxu0 %v783_v8  ;;  %855 = vmatprep.mubr.msk.f32.mxu0 %vm216_vm0, %v779_v10  ;;  %v771_v15 = vld [vmem:[%s1006_s23 + $0x9] sm:$0xff]  ;;  %v880_v18 = vpack.c.bf16 %v206_v14, %v205_v13  ;;  %v203_v23 = vld [vmem:[%s1006_s23] sm:$0xff]  ;;  %vm670_vm1 = vcmp.lt.s32.totalorder %v665_v37, 12 }
  0x1d   : > { %v796_v21 = vld [vmem:[%s1095_s1 + $0x68] sm:$0xff]  ;;  %v677_v59 = vld [vmem:[#allocation2] sm:$0x1]  ;;  %v687_v62 = vld [vmem:[#allocation3] sm:$0x1] }
  0x1e   : > { %836 = vmatpush3.msra.mxu1 %v774_v7  ;;  %v786_v24 = vld [vmem:[%s1006_s23 + $0x3] sm:$0xff]  ;;  %v892_v25 = vpack.c.bf16 %v796_v21, %v795_v20  ;;  %v787_v27 = vld [vmem:[%s1006_s23 + $0xb] sm:$0xff] }
  0x1f   : > { %854 = vmatpush3.msra.mxu0 %v783_v8  ;;  %838 = vmatmul.mubr.msk.f32.vlgmr.msra.gmra.mrb[0].mxu1 %vm216_vm0, %v771_v15  ;;  %v204_v26 = vld [vmem:[%s1006_s23 + $0x8] sm:$0xff] }
  0x20   : > { %856 = vmatmul.mubr.msk.f32.vlgmr.msra.gmra.mrb[0].mxu0 %vm216_vm0, %v780_v17  ;;  %889 = vmatprep.subr.bf16.mxu0 %v888_v16  ;;  %v793_v28 = vld [vmem:[%s1006_s23 + $0x4] sm:$0xff]  ;;  %v794_v30 = vld [vmem:[%s1006_s23 + $0xc] sm:$0xff] }
  0x21   : > { %891 = vmatpush3.bf16.msra.mxu0 %v888_v16  ;;  %881 = vmatprep.subr.bf16.mxu1 %v880_v18 }
  0x22   : > { %883 = vmatpush3.bf16.msra.mxu1 %v880_v18  ;;  %862 = vmatprep.subr.mxu0 %v790_v19 }
  0x23   : > { %844 = vmatprep.subr.mxu1 %v207_v22  ;;  %846 = vmatprep.mubr.msk.f32.mxu1 %vm216_vm0, %v203_v23 }
  0x24   : > { %864 = vmatprep.mubr.msk.f32.mxu0 %vm216_vm0, %v786_v24 }
  0x25   : > { %863 = vmatpush3.msra.mxu0 %v790_v19 }
  0x26   : > { %845 = vmatpush3.msra.mxu1 %v207_v22  ;;  %893 = vmatprep.subr.bf16.mxu0 %v892_v25 }
  0x27   : > { %847 = vmatmul.mubr.msk.f32.vlgmr.msra.gmra.mrb[0].mxu1 %vm216_vm0, %v204_v26 }
  0x28   : > { %865 = vmatmul.mubr.msk.f32.vlgmr.msra.gmra.mrb[0].mxu0 %vm216_vm0, %v787_v27 }
  0x29   : > { %895 = vmatpush3.bf16.msra.mxu0 %v892_v25  ;;  %873 = vmatprep.mubr.msk.f32.mxu0 %vm216_vm0, %v793_v28 }
  0x2a   : > { %871 = vmatprep.subr.mxu0 %v797_v29 }
  0x2d   : > { %872 = vmatpush3.msra.mxu0 %v797_v29 }
  0x30   : > { %874 = vmatmul.mubr.msk.f32.vlgmr.msra.gmra.mrb[0].mxu0 %vm216_vm0, %v794_v30 }
  0xfa   : > { %v848_v31 = vpop.f32.mrb[0].mxu1 }
  0xfb   : > { %v370_v32 = vpop.f32.mrb[1].mxu1 }
 0x103   : > { %v875_v35 = vpop.f32.mrb[0].mxu0 }
 0x104   : > { %v896_v38 = vadd.f32 %v875_v35, %v848_v31  ;;  %v641_v39 = vpop.f32.mrb[1].mxu0 }
 0x105   : > { %v897_v40 = vadd.f32 %v641_v39, %v370_v32 }
 0x106   : > { %v660_v41 = vadd.f32 %v896_v38, %v800_v36 }
 0x107   : > { %v659_v42 = vadd.f32 %v897_v40, %v800_v36 }
 0x108   : > { %v662_v43 = vmax.f32 %v660_v41, 0.0 }
 0x109   : > { %v661_v44 = vmax.f32 %v659_v42, 0.0 }
 0x10a   : > { %v676_v45 = vsel %vm670_vm1, %v662_v43, 0.0 }
 0x10b   : > { %v689_v46 = vmul.f32 %v676_v45, %v676_v45  ;;  %v678_v47 = vadd.f32 %v676_v45, %v661_v44  ;;  %v688_v48 = vmul.f32 %v661_v44, %v661_v44 }
 0x10d   : > { %v679_v49 = vrot.slane %v678_v47, 4  ;;  %v690_v50 = vadd.f32 %v689_v46, %v688_v48 }
 0x10f   : > { %v680_v51 = vadd.f32 %v679_v49, %v678_v47  ;;  %v691_v52 = vrot.slane %v690_v50, 4 }
 0x111   : > { %v681_v53 = vrot.slane %v680_v51, 2  ;;  %v692_v54 = vadd.f32 %v691_v52, %v690_v50 }
 0x113   : > { %v682_v55 = vadd.f32 %v681_v53, %v680_v51  ;;  %v693_v56 = vrot.slane %v692_v54, 2 }
 0x115   : > { %v683_v57 = vrot.slane %v682_v55, 1  ;;  %v694_v58 = vadd.f32 %v693_v56, %v692_v54 }
 0x117   : > { %v684_v60 = vadd.f32 %v683_v57, %v682_v55  ;;  %v695_v61 = vrot.slane %v694_v58, 1  ;;  %703 = sbr.rel (!%p699_p6) target bundleno = 294 (0x126), region = 40 }
 0x119   : > { %v685_v63 = vadd.f32 %v684_v60, %v677_v59  ;;  %v696_v0 = vadd.f32 %v695_v61, %v694_v58 }
 0x11b   : > { %686 = vst [vmem:[#allocation2] sm:$0x1] %v685_v63  ;;  %v697_v1 = vadd.f32 %v696_v0, %v687_v62 }
 0x11d   : > { %698 = vst [vmem:[#allocation3] sm:$0x1] %v697_v1 }
 0x122   : > { %v704_v2 = vld [vmem:[#allocation2] sm:$0x1] }
 0x123   : > { %705 = vst [vmem:[%s1097_s3] sm:$0x1] %v704_v2 }
 0x124   : > { %v706_v3 = vld [vmem:[#allocation3] sm:$0x1] }
 0x125   : > { %707 = vst [vmem:[%s1098_s4] sm:$0x1] %v706_v3 }
 0x126 PF: > { %s15_s17 = sadd.s32 1, %s952_s17   ;;  %s1099_s15 = smov %s948_s16 }
 0x127   : > { %p12_p7 = scmp.ge.s32.totalorder %s15_s17, 4   ;;  %s1100_s16 = smov %s1102_s18 }
 0x129   :  { %14 = sbr.rel (!%p12_p7) target bundleno = 2 (0x2), region = 83 }

</bundles_post_ra>
